<compile_context>
chip_gen: v7x
topology: tpu7x:2x2x1
jax: 0.10.0
libtpu: 0.0.40
codegen_flags: <defaults>
</compile_context>

<pallas_src>
import functools

import jax
import jax.numpy as jnp
from jax.experimental import pallas as pl
from jax.experimental.pallas import tpu as pltpu


def _round_up(x, m):
    return ((x + m - 1) // m) * m


# ----------------------------------------------------------------------------
# Pallas kernels
# ----------------------------------------------------------------------------
def _conv_tap_kernel(*refs, taps, Ho, Wo, relu, has_res, has_ds):
    """Direct convolution with in-kernel tap accumulation.

    refs (in order): xk (1,HK,WK,Cin) bf16, w (T,Cin,Cout) bf16, b (1,Cout) f32,
        [res (1,Ho*Wo,Cout) bf16] | [xd (1,Ho*Wo,Cind) bf16, wd (Cind,Cout) bf16],
        out (1,Ho*Wo,Cout) bf16.
    Per static tap t with offsets (ro, co):
        acc += xk[0, ro:ro+Ho, co:co+Wo, :] @ w[t]        (f32 accumulation on MXU)
    Epilogue: + bias (+ downsample matmul) (+ residual), ReLU, cast to bf16.
    """
    it = iter(refs)
    xk_ref = next(it)
    w_ref = next(it)
    b_ref = next(it)
    r_ref = next(it) if has_res else None
    xd_ref = next(it) if has_ds else None
    wd_ref = next(it) if has_ds else None
    o_ref = next(it)

    cin = xk_ref.shape[-1]
    cout = o_ref.shape[-1]
    acc = jnp.zeros((Ho * Wo, cout), jnp.float32)
    for t, (ro, co) in enumerate(taps):
        patch = xk_ref[0, ro:ro + Ho, co:co + Wo, :].reshape(Ho * Wo, cin)
        acc = acc + jnp.dot(patch, w_ref[t], preferred_element_type=jnp.float32)
    if has_ds:
        acc = acc + jnp.dot(xd_ref[0], wd_ref[...], preferred_element_type=jnp.float32)
    acc = acc + b_ref[...]
    if has_res:
        acc = acc + r_ref[0].astype(jnp.float32)
    if relu:
        acc = jnp.maximum(acc, 0.0)
    o_ref[0] = acc.astype(o_ref.dtype)


def _maxpool_tap_kernel(xk_ref, o_ref, *, taps, Ho, Wo):
    """3x3 max pool as a chain of VPU maxima over 9 static window slices."""
    ro0, co0 = taps[0]
    m = xk_ref[0, ro0:ro0 + Ho, co0:co0 + Wo, :]
    for ro, co in taps[1:]:
        m = jnp.maximum(m, xk_ref[0, ro:ro + Ho, co:co + Wo, :])
    o_ref[0] = m


def _matmul_bias_kernel(x_ref, w_ref, b_ref, o_ref, *, relu):
    """Stem conv (im2col patches) matmul + bias + ReLU."""
    acc = jnp.dot(x_ref[...], w_ref[...], preferred_element_type=jnp.float32)
    acc = acc + b_ref[...]
    if relu:
        acc = jnp.maximum(acc, 0.0)
    o_ref[...] = acc.astype(o_ref.dtype)


def _avgpool_fc_kernel(x_ref, w_ref, b_ref, o_ref):
    """Global avg pool (accumulate over leading H*W axis, VPU adds) + FC matmul."""
    hw = x_ref.shape[0]
    s = x_ref[0].astype(jnp.float32)
    for i in range(1, hw):
        s = s + x_ref[i].astype(jnp.float32)
    pooled = (s * (1.0 / hw)).astype(jnp.bfloat16)
    o_ref[...] = (jnp.dot(pooled, w_ref[...], preferred_element_type=jnp.float32)
                  + b_ref[...])


# ----------------------------------------------------------------------------
# BN folding helpers (eval-mode BatchNorm folded into conv weights/bias)
# ----------------------------------------------------------------------------
def _fold_bn_taps(w_oihw, bn):
    gamma, beta, mean, var = bn
    Cout, Cin, kh, kw = w_oihw.shape
    s = gamma / jnp.sqrt(var + 1e-5)
    w3 = (jnp.transpose(w_oihw, (2, 3, 1, 0)).reshape(kh * kw, Cin, Cout)
          * s[None, None, :])
    b = beta - s * mean
    return w3.astype(jnp.bfloat16), b.astype(jnp.float32)


def _fold_bn_1x1(w_oihw, bn, conv_bias):
    gamma, beta, mean, var = bn
    Cout, Cin = w_oihw.shape[:2]
    s = gamma / jnp.sqrt(var + 1e-5)
    w2 = w_oihw.reshape(Cout, Cin).T * s[None, :]
    b = beta + s * (conv_bias - mean)
    return w2.astype(jnp.bfloat16), b.astype(jnp.float32)


def _fold_bn_im2col(w_oihw, bn):
    gamma, beta, mean, var = bn
    Cout, Cin, kh, kw = w_oihw.shape
    s = gamma / jnp.sqrt(var + 1e-5)
    w2d = jnp.transpose(w_oihw, (2, 3, 1, 0)).reshape(kh * kw * Cin, Cout) * s[None, :]
    b = beta - s * mean
    return w2d.astype(jnp.bfloat16), b.astype(jnp.float32)


# ----------------------------------------------------------------------------
# Wrappers
# ----------------------------------------------------------------------------
def _phase_stack_s2(xp, Hh, Wh, pad_value=0.0):
    """Even/odd phase decomposition for stride-2 window access.

    Returns xk (N, 4*Hh, Wh, C) with xk[:, (2r+c)*Hh + i, j, :] == xp[:, 2i+r, 2j+c, :]
    (entries padded with pad_value are never read for valid output positions).
    Total size ~= size of xp: one relayout copy, no 9x im2col blowup.
    """
    phases = []
    for r in range(2):
        for c in range(2):
            ph = xp[:, r::2, c::2, :][:, :Hh, :Wh, :]
            ph = jnp.pad(
                ph,
                ((0, 0), (0, Hh - ph.shape[1]), (0, Wh - ph.shape[2]), (0, 0)),
                constant_values=pad_value)
            phases.append(ph)
    return jnp.concatenate(phases, axis=1)


def _conv_tap_call(xk, w3, bias, Ho, Wo, taps, *, residual=None, x_ds=None,
                   w_ds=None, relu=True):
    N = xk.shape[0]
    Cout = w3.shape[-1]
    args = [xk, w3, bias.reshape(1, Cout)]
    in_specs = [
        pl.BlockSpec((1,) + xk.shape[1:], lambda n: (n, 0, 0, 0)),
        pl.BlockSpec(w3.shape, lambda n: (0, 0, 0)),      # grid-invariant -> fetched once
        pl.BlockSpec((1, Cout), lambda n: (0, 0)),
    ]
    has_res = residual is not None
    has_ds = x_ds is not None
    if has_res:
        args.append(residual)
        in_specs.append(pl.BlockSpec((1, Ho * Wo, Cout), lambda n: (n, 0, 0)))
    if has_ds:
        args += [x_ds, w_ds]
        in_specs += [
            pl.BlockSpec((1, Ho * Wo, x_ds.shape[-1]), lambda n: (n, 0, 0)),
            pl.BlockSpec(w_ds.shape, lambda n: (0, 0)),
        ]
    kernel = functools.partial(_conv_tap_kernel, taps=tuple(taps), Ho=Ho, Wo=Wo,
                               relu=relu, has_res=has_res, has_ds=has_ds)
    out = pl.pallas_call(
        kernel,
        out_shape=jax.ShapeDtypeStruct((N, Ho * Wo, Cout), jnp.bfloat16),
        grid=(N,),
        in_specs=in_specs,
        out_specs=pl.BlockSpec((1, Ho * Wo, Cout), lambda n: (n, 0, 0)),
        compiler_params=pltpu.CompilerParams(dimension_semantics=("parallel",)),
    )(*args)
    return out.reshape(N, Ho, Wo, Cout)


def conv3x3_bn(x, w_oihw, bn, stride, relu=True, residual=None, downsample=None):
    """3x3 conv + folded BN (+ fused residual / 1x1-downsample branch) + ReLU.

    x: (N,H,W,Cin) bf16 NHWC.  residual: (N, Ho*Wo, Cout) bf16.
    downsample: (x_ds (N,Ho*Wo,Cind) bf16, w_ds (Cind,Cout) bf16, b_ds (Cout,) f32).
    """
    N, H, W, Cin = x.shape
    w3, b = _fold_bn_taps(w_oihw, bn)
    if downsample is not None:
        xd, wd, bd = downsample
        b = b + bd
    else:
        xd = wd = None

    xp = jnp.pad(x, ((0, 0), (1, 1), (1, 1), (0, 0)))
    if stride == 1:
        Ho, Wo = H, W
        xk = xp
        taps = [(ki, kj) for ki in range(3) for kj in range(3)]
    elif stride == 2:
        Ho = (H - 1) // 2 + 1
        Wo = (W - 1) // 2 + 1
        Hh, Wh = Ho + 1, Wo + 1
        xk = _phase_stack_s2(xp, Hh, Wh)
        taps = [(((ki % 2) * 2 + (kj % 2)) * Hh + ki // 2, kj // 2)
                for ki in range(3) for kj in range(3)]
    else:
        raise NotImplementedError(f"stride={stride}")

    return _conv_tap_call(xk, w3, b, Ho, Wo, taps,
                          residual=residual, x_ds=xd, w_ds=wd, relu=relu)


def _im2col(x, kh, kw, stride, padding):
    """Stem-only: patch matrix (N*Ho*Wo, kh*kw*C) built by XLA (Cin=3)."""
    N, H, W, C = x.shape
    Ho = (H + 2 * padding - kh) // stride + 1
    Wo = (W + 2 * padding - kw) // stride + 1
    xp = jnp.pad(x, ((0, 0), (padding, padding), (padding, padding), (0, 0)))
    cols = [xp[:, i:i + stride * Ho:stride, j:j + stride * Wo:stride, :]
            for i in range(kh) for j in range(kw)]
    patches = jnp.stack(cols, axis=3)                     # (N, Ho, Wo, kh*kw, C)
    return patches.reshape(N * Ho * Wo, kh * kw * C), Ho, Wo


def stem_conv_bn_relu(x, w_oihw, bn):
    """7x7 stride-2 pad-3 conv + folded BN + ReLU via im2col matmul."""
    N = x.shape[0]
    Cout, _, kh, kw = w_oihw.shape
    patches, Ho, Wo = _im2col(x, kh, kw, stride=2, padding=3)
    w2d, b = _fold_bn_im2col(w_oihw, bn)
    M, K = patches.shape
    if M >= 16:
        num_m = max(2, (M + 1023) // 1024)      # >=2 M-tiles keeps both v7x TCs busy
        TM = _round_up(-(-M // num_m), 8)
    else:
        TM = _round_up(max(M, 1), 8)
    Mp = _round_up(M, TM)
    if Mp != M:
        patches = jnp.pad(patches, ((0, Mp - M), (0, 0)))
    out = pl.pallas_call(
        functools.partial(_matmul_bias_kernel, relu=True),
        out_shape=jax.ShapeDtypeStruct((Mp, Cout), jnp.bfloat16),
        grid=(Mp // TM,),
        in_specs=[
            pl.BlockSpec((TM, K), lambda i: (i, 0)),
            pl.BlockSpec((K, Cout), lambda i: (0, 0)),    # weight-stationary
            pl.BlockSpec((1, Cout), lambda i: (0, 0)),
        ],
        out_specs=pl.BlockSpec((TM, Cout), lambda i: (i, 0)),
        compiler_params=pltpu.CompilerParams(dimension_semantics=("parallel",)),
    )(patches, w2d, b.reshape(1, Cout))
    if Mp != M:
        out = out[:M]
    return out.reshape(N, Ho, Wo, Cout)


def maxpool_3x3_s2_p1(x):
    """3x3 stride-2 pad-1 max pool: in-kernel 9-tap max over a phase-split input."""
    N, H, W, C = x.shape
    Ho = (H - 1) // 2 + 1
    Wo = (W - 1) // 2 + 1
    xp = jnp.pad(x, ((0, 0), (1, 1), (1, 1), (0, 0)),
                 constant_values=-jnp.inf)       # PyTorch maxpool padding semantics
    Hh, Wh = Ho + 1, Wo + 1
    xk = _phase_stack_s2(xp, Hh, Wh, pad_value=-jnp.inf)
    taps = tuple((((ki % 2) * 2 + (kj % 2)) * Hh + ki // 2, kj // 2)
                 for ki in range(3) for kj in range(3))
    out = pl.pallas_call(
        functools.partial(_maxpool_tap_kernel, taps=taps, Ho=Ho, Wo=Wo),
        out_shape=jax.ShapeDtypeStruct((N, Ho, Wo, C), x.dtype),
        grid=(N,),
        in_specs=[pl.BlockSpec((1, 4 * Hh, Wh, C), lambda n: (n, 0, 0, 0))],
        out_specs=pl.BlockSpec((1, Ho, Wo, C), lambda n: (n, 0, 0, 0)),
        compiler_params=pltpu.CompilerParams(dimension_semantics=("parallel",)),
    )(xk)
    return out


def avgpool_fc(x, fc_w, fc_b):
    """Fused global average pool + FC: x (N,H,W,C) -> logits (N, num_classes) f32."""
    N, H, W, C = x.shape
    num_classes = fc_w.shape[0]
    xr = jnp.transpose(x.reshape(N, H * W, C), (1, 0, 2))   # (H*W, N, C)
    return pl.pallas_call(
        _avgpool_fc_kernel,
        out_shape=jax.ShapeDtypeStruct((N, num_classes), jnp.float32),
    )(xr, fc_w.T.astype(jnp.bfloat16),
      fc_b.astype(jnp.float32).reshape(1, num_classes))


# ----------------------------------------------------------------------------
# ResNet forward (BasicBlock, expansion = 1)
# ----------------------------------------------------------------------------
def basic_block(x, bp):
    stride = bp["stride"]
    N, H, W, Cin = x.shape
    planes = bp["conv1_w"].shape[0]

    out1 = conv3x3_bn(x, bp["conv1_w"], bp["bn1"], stride=stride, relu=True)
    _, Ho, Wo, _ = out1.shape

    if "ds_w" in bp:
        wd, bd = _fold_bn_1x1(bp["ds_w"], bp["ds_bn"], bp["ds_b"])
        xd = x[:, ::stride, ::stride, :][:, :Ho, :Wo, :].reshape(N, Ho * Wo, Cin)
        out = conv3x3_bn(out1, bp["conv2_w"], bp["bn2"], stride=1, relu=True,
                         downsample=(xd, wd, bd))
    else:
        res = x.reshape(N, H * W, planes)
        out = conv3x3_bn(out1, bp["conv2_w"], bp["bn2"], stride=1, relu=True,
                         residual=res)
    return out


def resnet_forward(params, x_nchw):
    x = jnp.transpose(x_nchw, (0, 2, 3, 1)).astype(jnp.bfloat16)   # NCHW -> NHWC, bf16
    x = stem_conv_bn_relu(x, params["conv1_w"], params["bn1"])
    x = maxpool_3x3_s2_p1(x)
    for blocks in params["layers"]:
        for bp in blocks:
            x = basic_block(x, bp)
    return avgpool_fc(x, params["fc_w"], params["fc_b"])           # (N, classes) f32


# ----------------------------------------------------------------------------
# Deterministic parameter init (shapes implied by the PyTorch module)
# ----------------------------------------------------------------------------
def init_params(key, layer_list=(1, 1, 1, 1), num_classes=10, num_channels=3):
    keys = iter(jax.random.split(key, 256))

    def conv_w(shape):
        fan_in = shape[1] * shape[2] * shape[3]
        return jax.random.normal(next(keys), shape, jnp.float32) * jnp.sqrt(2.0 / fan_in)

    def bn(c):
        gamma = 1.0 + 0.1 * jax.random.normal(next(keys), (c,), jnp.float32)
        beta = 0.1 * jax.random.normal(next(keys), (c,), jnp.float32)
        mean = 0.1 * jax.random.normal(next(keys), (c,), jnp.float32)
        var = 1.0 + 0.1 * jnp.abs(jax.random.normal(next(keys), (c,), jnp.float32))
        return (gamma, beta, mean, var)

    params = {"conv1_w": conv_w((64, num_channels, 7, 7)), "bn1": bn(64)}
    in_c = 64
    layers = []
    for li, (planes, blocks) in enumerate(zip((64, 128, 256, 512), layer_list)):
        layer_stride = 1 if li == 0 else 2
        blocks_p = []
        for b in range(blocks):
            s = layer_stride if b == 0 else 1
            bp = {
                "conv1_w": conv_w((planes, in_c, 3, 3)), "bn1": bn(planes),
                "conv2_w": conv_w((planes, planes, 3, 3)), "bn2": bn(planes),
                "stride": s,
            }
            if b == 0 and (layer_stride != 1 or in_c != planes):
                # The spec's downsample conv has a bias (nn.Conv2d default).
                bp["ds_w"] = conv_w((planes, in_c, 1, 1))
                bp["ds_b"] = 0.1 * jax.random.normal(next(keys), (planes,), jnp.float32)
                bp["ds_bn"] = bn(planes)
            blocks_p.append(bp)
            in_c = planes
        layers.append(blocks_p)
    params["layers"] = layers
    params["fc_w"] = (jax.random.normal(next(keys), (num_classes, 512), jnp.float32)
                      / jnp.sqrt(512.0))
    params["fc_b"] = 0.1 * jax.random.normal(next(keys), (num_classes,), jnp.float32)
    return params


if __name__ == "__main__":
    key = jax.random.PRNGKey(0)
    pkey, xkey = jax.random.split(key)
    params = init_params(pkey, layer_list=(1, 1, 1, 1), num_classes=10, num_channels=3)
    x = jax.random.normal(xkey, (2, 3, 32, 32), jnp.float32)   # NCHW, like PyTorch
    logits = resnet_forward(params, x)
    jax.block_until_ready(logits)
    assert logits.shape == (2, 10), logits.shape
    assert bool(jnp.all(jnp.isfinite(logits)))
    print("KERNEL_OK")
</pallas_src>

<mosaic_0001>
module attributes {stable_mosaic.version = 11 : i64} {
  func.func @_matmul_bias_kernel(%arg0: i32, %arg1: memref<256x147xbf16, #tpu.memory_space<vmem>>, %arg2: memref<147x64xbf16, #tpu.memory_space<vmem>>, %arg3: memref<1x64xf32, #tpu.memory_space<vmem>>, %arg4: memref<256x64xbf16, #tpu.memory_space<vmem>>) attributes {dimension_semantics = [#tpu.dimension_semantics<parallel>], iteration_bounds = array<i64: 2>, scalar_prefetch = 0 : i64, scratch_operands = 0 : i64, tpu.core_type = #tpu.core_type<tc>, window_params = [{transform_indices = @transform_0, window_bounds = array<i64: 256, 147>}, {pipeline_mode = #tpu.pipeline_mode<synchronous>, transform_indices = @transform_1, window_bounds = array<i64: 147, 64>}, {pipeline_mode = #tpu.pipeline_mode<synchronous>, transform_indices = @transform_2, window_bounds = array<i64: 1, 64>}, {transform_indices = @transform_3, window_bounds = array<i64: 256, 64>}]} {
    %c0 = arith.constant 0 : index
    %c0_0 = arith.constant 0 : index
    %0 = vector.load %arg1[%c0, %c0_0] : memref<256x147xbf16, #tpu.memory_space<vmem>>, vector<256x147xbf16>
    %c0_1 = arith.constant 0 : index
    %c0_2 = arith.constant 0 : index
    %1 = vector.load %arg2[%c0_1, %c0_2] : memref<147x64xbf16, #tpu.memory_space<vmem>>, vector<147x64xbf16>
    %cst = arith.constant dense<0.000000e+00> : vector<256x64xf32>
    %2 = tpu.matmul %0, %1, %cst {dimension_numbers = #tpu.dot_dimension_numbers<[1], [0], [0], [1], [0, 0, 1, 1], [], []>} : vector<256x147xbf16>, vector<147x64xbf16>, vector<256x64xf32> -> vector<256x64xf32>
    %c0_3 = arith.constant 0 : index
    %c0_4 = arith.constant 0 : index
    %3 = vector.load %arg3[%c0_3, %c0_4] : memref<1x64xf32, #tpu.memory_space<vmem>>, vector<1x64xf32>
    %4 = vector.broadcast %3 : vector<1x64xf32> to vector<256x64xf32>
    %5 = arith.addf %2, %4 : vector<256x64xf32>
    %cst_5 = arith.constant 0.000000e+00 : f32
    %6 = vector.broadcast %cst_5 : f32 to vector<256x64xf32>
    %7 = arith.maximumf %5, %6 : vector<256x64xf32>
    %8 = arith.truncf %7 : vector<256x64xf32> to vector<256x64xbf16>
    %c0_6 = arith.constant 0 : index
    %c0_7 = arith.constant 0 : index
    %9 = vector.load %arg4[%c0_6, %c0_7] : memref<256x64xbf16, #tpu.memory_space<vmem>>, vector<256x64xbf16>
    tpu.vector_store %arg4[%c0_6, %c0_7], %8 {strides = array<i32>} : memref<256x64xbf16, #tpu.memory_space<vmem>>, vector<256x64xbf16>,
    return
  }
  func.func @transform_0(%arg0: i32) -> (i32, i32) {
    %c0_i32 = arith.constant 0 : i32
    %c0_i32_0 = arith.constant 0 : i32
    return %arg0, %c0_i32 : i32, i32
  }
  func.func @transform_1(%arg0: i32) -> (i32, i32) {
    %c0_i32 = arith.constant 0 : i32
    %c0_i32_0 = arith.constant 0 : i32
    %c0_i32_1 = arith.constant 0 : i32
    return %c0_i32, %c0_i32_0 : i32, i32
  }
  func.func @transform_2(%arg0: i32) -> (i32, i32) {
    %c0_i32 = arith.constant 0 : i32
    %c0_i32_0 = arith.constant 0 : i32
    %c0_i32_1 = arith.constant 0 : i32
    return %c0_i32, %c0_i32_0 : i32, i32
  }
  func.func @transform_3(%arg0: i32) -> (i32, i32) {
    %c0_i32 = arith.constant 0 : i32
    %c0_i32_0 = arith.constant 0 : i32
    return %arg0, %c0_i32 : i32, i32
  }
}

</mosaic_0001>

<bundles_post_ra>
// kernel: tpu_custom_call.1
= control target key start
LH: loop header
LB: loop body
LE: loop exit
PB: predicated region body
PF: predicated region fallthrough
CT: control target
= control target key end

     0   :  { %s1157_s12 = smov 0   ;;  %s1361_s0 = inlined_call_operand.vmem [shape: bf16[512,147], index: 0, kind: input, shape index: {}]   ;;  %s1362_s1 = inlined_call_operand.vmem [shape: bf16[147,64], index: 1, kind: input, shape index: {}]   ;;  %s1363_s2 = inlined_call_operand.vmem [shape: f32[1,64], index: 2, kind: input, shape index: {}]   ;;  %s1364_s3 = inlined_call_operand.vmem [shape: bf16[512,64], index: 3, kind: output, shape index: {}]  }
   0x1 LB: > { %s903_s13 = sadd.s32 4294967295, %s1133_s12   ;;  %p907_p0 = scmp.ge.s32.totalorder %s1133_s12, 1  ;;  %s1133_s12 = sphi %s1157_s12, %s13_s12  }
   0x2   : > { %p139_p1 = scmp.lt.s32.totalorder %s1133_s12, 3 }
   0x4   : > { %p140_p2 = pnand %p907_p0, %p139_p1 }
   0x5   : > { %v1069_v0 = vld [vmem:[%s1362_s1] sm:$0xff] (!%p140_p2)   ;;  %v1135_v1 = vmov (!%p140_p2), 0   ;;  %v1070_v2 = vld [vmem:[%s1362_s1 + $0x8] sm:$0xff] (!%p140_p2)   ;;  %v1071_v3 = vld [vmem:[%s1362_s1 + $0x10] sm:$0xff] (!%p140_p2)   ;;  %s908_s20 = sshll.u32 (!%p140_p2), %s903_s13, 5  ;;  %vm437_vm0 = vcmask (!%p140_p2), 154624  }
   0x6   : > { %143 = sbr.rel (%p140_p2) target bundleno = 323 (0x143), region = 32  ;;  %493 = vmatprep.subr.bf16.mxu0 (!%p140_p2), %v1135_v1  ;;  %1039 = vmatprep.subr.bf16.mxu1 (!%p140_p2), %v1135_v1  ;;  %p165_p3 = scmp.lt.s32.totalorder (!%p140_p2), %s908_s20, 63  ;;  %v1072_v4 = vld [vmem:[%s1362_s1 + $0x18] sm:$0xff] (!%p140_p2)   ;;  %v1073_v5 = vld [vmem:[%s1362_s1 + $0x20] sm:$0xff] (!%p140_p2)   ;;  %v1074_v8 = vld [vmem:[%s1362_s1 + $0x28] sm:$0xff] (!%p140_p2)   ;;  %vm486_vm1 = vcmask (!%p140_p2), 1040384  }
   0x7   : > { %494 = vmatpush1.bf16.msra.mxu0 (!%p140_p2), %v1069_v0  ;;  %1049 = vmatpush1.bf16.msra.mxu1 (!%p140_p2), %v1069_v0  ;;  %v1075_v9 = vld [vmem:[%s1362_s1 + $0x30] sm:$0xff] (!%p140_p2)   ;;  %v1076_v10 = vld [vmem:[%s1362_s1 + $0x38] sm:$0xff] (!%p140_p2)   ;;  %vm487_vm2 = vcmask (!%p140_p2), 1041408   ;;  %v1136_v11 = vmov (!%p140_p2), 65535   ;;  %v1077_v13 = vld [vmem:[%s1362_s1 + $0x40] sm:$0xff] (!%p140_p2)   ;;  %vm814_vm3 = vcmask (!%p140_p2), 519168  }
   0x8   : > { %495 = vmatprep.subr.bf16.mxu0 (!%p140_p2), %v1135_v1  ;;  %1040 = vmatprep.subr.bf16.mxu1 (!%p140_p2), %v1135_v1  ;;  %v488_v12 = vsel (!%p140_p2), %vm486_vm1, 4294967295, %v1136_v11  ;;  %v1078_v14 = vld [vmem:[%s1362_s1 + $0x48] ss:$0 sps:$4 sm:$0x33] (!%p140_p2)   ;;  %v1254_v47 = vld [vmem:[%s1363_s2] ss:$0 sm:$0xff] (!%p140_p2) }
   0x9   : > { %v489_v15 = vsel (!%p140_p2), %vm487_vm2, %v488_v12, 0 }
   0xa   : > { %v491_v16 = vand.u32 (!%p140_p2), %v1078_v14, %v489_v15 }
   0xb   : > { %496 = vmatpush1.bf16.msra.mxu0 (!%p140_p2), %v1070_v2  ;;  %1050 = vmatpush1.bf16.msra.mxu1 (!%p140_p2), %v1070_v2 }
   0xc   : > { %497 = vmatprep.subr.bf16.mxu0 (!%p140_p2), %v1135_v1  ;;  %1041 = vmatprep.subr.bf16.mxu1 (!%p140_p2), %v1135_v1 }
   0xd   : > { %s1366_s20 = smov (!%p165_p3, %s908_s20), 63 }
   0xe   : > { %s1006_s23 = sshll.u32 %s1366_s20, 3  ;;  %s912_s15 = sshll.u32 %s1366_s20, 2 }
   0xf   : > { %498 = vmatpush1.bf16.msra.mxu0 %v1071_v3  ;;  %1051 = vmatpush1.bf16.msra.mxu1 %v1071_v3  ;;  %s1183_s26 = scalar_lea.vmem %s1361_s0, %s1006_s23  ;;  %s1264_s18 = scalar_lea.vmem %s1364_s3, %s912_s15 }
  0x10   : > { %499 = vmatprep.subr.bf16.mxu0 %v1135_v1  ;;  %1042 = vmatprep.subr.bf16.mxu1 %v1135_v1  ;;  %v1081_v6 = vld [vmem:[%s1183_s26 + $0x4] ss:$8 sps:$4 sm:$0xff]   ;;  %v1079_v17 = vld [vmem:[%s1183_s26] ss:$8 sps:$4 sm:$0xff]   ;;  %v1085_v19 = vld [vmem:[%s1183_s26 + $0x14] ss:$8 sps:$4 sm:$0xff]  }
  0x11   : > { %v1084_v7 = vld [vmem:[%s1183_s26 + $0x84] ss:$8 sps:$4 sm:$0xff]   ;;  %956 = vmatprep.mubr.msk.bf16.mxu0 %vm437_vm0, %v1081_v6  ;;  %v1082_v18 = vld [vmem:[%s1183_s26 + $0x80] ss:$8 sps:$4 sm:$0xff]   ;;  %v1087_v20 = vld [vmem:[%s1183_s26 + $0x94] ss:$8 sps:$4 sm:$0xff]  }
  0x12   : > { %964 = vmatprep.mubr.msk.bf16.mxu1 %vm437_vm0, %v1084_v7  ;;  %v1089_v21 = vld [vmem:[%s1183_s26 + $0x10] ss:$8 sps:$4 sm:$0xff]   ;;  %v1091_v23 = vld [vmem:[%s1183_s26 + $0x24] ss:$8 sps:$4 sm:$0xff]   ;;  %v1095_v25 = vld [vmem:[%s1183_s26 + $0x20] ss:$8 sps:$4 sm:$0xff]  }
  0x13   : > { %500 = vmatpush1.bf16.msra.mxu0 %v1072_v4  ;;  %1052 = vmatpush1.bf16.msra.mxu1 %v1072_v4  ;;  %v1090_v22 = vld [vmem:[%s1183_s26 + $0x90] ss:$8 sps:$4 sm:$0xff]   ;;  %v1093_v24 = vld [vmem:[%s1183_s26 + $0xa4] ss:$8 sps:$4 sm:$0xff]   ;;  %v1096_v26 = vld [vmem:[%s1183_s26 + $0xa0] ss:$8 sps:$4 sm:$0xff]  }
  0x14   : > { %501 = vmatprep.subr.bf16.mxu0 %v1135_v1  ;;  %1043 = vmatprep.subr.bf16.mxu1 %v1135_v1  ;;  %v1097_v27 = vld [vmem:[%s1183_s26 + $0x34] ss:$8 sps:$4 sm:$0xff]   ;;  %v1101_v29 = vld [vmem:[%s1183_s26 + $0x30] ss:$8 sps:$4 sm:$0xff]   ;;  %v1103_v31 = vld [vmem:[%s1183_s26 + $0x44] ss:$8 sps:$4 sm:$0xff]  }
  0x15   : > { %v1099_v28 = vld [vmem:[%s1183_s26 + $0xb4] ss:$8 sps:$4 sm:$0xff]   ;;  %v1102_v30 = vld [vmem:[%s1183_s26 + $0xb0] ss:$8 sps:$4 sm:$0xff]   ;;  %v1105_v32 = vld [vmem:[%s1183_s26 + $0xc4] ss:$8 sps:$4 sm:$0xff]  }
  0x16   : > { %v1107_v33 = vld [vmem:[%s1183_s26 + $0x40] ss:$8 sps:$4 sm:$0xff]   ;;  %v1109_v35 = vld [vmem:[%s1183_s26 + $0x54] ss:$8 sps:$4 sm:$0xff]   ;;  %v1113_v37 = vld [vmem:[%s1183_s26 + $0x50] ss:$8 sps:$4 sm:$0xff]  }
  0x17   : > { %502 = vmatpush1.bf16.msra.mxu0 %v1073_v5  ;;  %1053 = vmatpush1.bf16.msra.mxu1 %v1073_v5  ;;  %v1108_v34 = vld [vmem:[%s1183_s26 + $0xc0] ss:$8 sps:$4 sm:$0xff]   ;;  %v1111_v36 = vld [vmem:[%s1183_s26 + $0xd4] ss:$8 sps:$4 sm:$0xff]   ;;  %v1114_v38 = vld [vmem:[%s1183_s26 + $0xd0] ss:$8 sps:$4 sm:$0xff]  }
  0x18   : > { %503 = vmatprep.subr.bf16.mxu0 %v1135_v1  ;;  %1044 = vmatprep.subr.bf16.mxu1 %v1135_v1  ;;  %v1115_v39 = vld [vmem:[%s1183_s26 + $0x64] ss:$8 sps:$4 sm:$0xff]   ;;  %v1119_v41 = vld [vmem:[%s1183_s26 + $0x60] ss:$8 sps:$4 sm:$0xff]   ;;  %v1121_v43 = vld [vmem:[%s1183_s26 + $0x74] ss:$8 sps:$4 sm:$0xff]  }
  0x19   : > { %v1117_v40 = vld [vmem:[%s1183_s26 + $0xe4] ss:$8 sps:$4 sm:$0xff]   ;;  %v1120_v42 = vld [vmem:[%s1183_s26 + $0xe0] ss:$8 sps:$4 sm:$0xff]   ;;  %v1123_v44 = vld [vmem:[%s1183_s26 + $0xf4] ss:$8 sps:$4 sm:$0xff]  }
  0x1a   : > { %v1125_v45 = vld [vmem:[%s1183_s26 + $0x70] ss:$8 sps:$4 sm:$0xff]  }
  0x1b   : > { %504 = vmatpush1.bf16.msra.mxu0 %v1074_v8  ;;  %1054 = vmatpush1.bf16.msra.mxu1 %v1074_v8  ;;  %v1126_v46 = vld [vmem:[%s1183_s26 + $0xf0] ss:$8 sps:$4 sm:$0xff]  }
  0x1c   : > { %505 = vmatprep.subr.bf16.mxu0 %v1135_v1  ;;  %1045 = vmatprep.subr.bf16.mxu1 %v1135_v1 }
  0x1f   : > { %506 = vmatpush1.bf16.msra.mxu0 %v1075_v9  ;;  %1055 = vmatpush1.bf16.msra.mxu1 %v1075_v9 }
  0x20   : > { %507 = vmatprep.subr.bf16.mxu0 %v1135_v1  ;;  %1046 = vmatprep.subr.bf16.mxu1 %v1135_v1 }
  0x23   : > { %508 = vmatpush1.bf16.msra.mxu0 %v1076_v10  ;;  %1056 = vmatpush1.bf16.msra.mxu1 %v1076_v10 }
  0x24   : > { %509 = vmatprep.subr.bf16.mxu0 %v1135_v1  ;;  %1047 = vmatprep.subr.bf16.mxu1 %v1135_v1 }
  0x27   : > { %510 = vmatpush1.bf16.msra.mxu0 %v1077_v13  ;;  %1057 = vmatpush1.bf16.msra.mxu1 %v1077_v13 }
  0x28   : > { %511 = vmatprep.subr.bf16.mxu0 %v1135_v1  ;;  %1048 = vmatprep.subr.bf16.mxu1 %v1135_v1 }
  0x2b   : > { %512 = vmatpush1.bf16.msra.mxu0 %v491_v16  ;;  %1058 = vmatpush1.bf16.msra.mxu1 %v491_v16 }
  0x2e   : > { %526 = vmatmul.mubr.bf16.vlgmr.msra.gmra.mrb[0].mxu0 %v1079_v17  ;;  %590 = vmatmul.mubr.bf16.vlgmr.msra.gmra.mrb[0].mxu1 %v1082_v18 }
  0x2f   : > { %957 = vmatprep.mubr.msk.bf16.mxu0 %vm437_vm0, %v1085_v19  ;;  %965 = vmatprep.mubr.msk.bf16.mxu1 %vm437_vm0, %v1087_v20 }
  0x36   : > { %534 = vmatmul.mubr.bf16.gmra.mrb[4].mxu0 %v1089_v21  ;;  %598 = vmatmul.mubr.bf16.gmra.mrb[4].mxu1 %v1090_v22 }
  0x37   : > { %958 = vmatprep.mubr.msk.bf16.mxu0 %vm437_vm0, %v1091_v23  ;;  %966 = vmatprep.mubr.msk.bf16.mxu1 %vm437_vm0, %v1093_v24 }
  0x3e   : > { %542 = vmatmul.mubr.bf16.gmra.mrb[8].mxu0 %v1095_v25  ;;  %606 = vmatmul.mubr.bf16.gmra.mrb[8].mxu1 %v1096_v26 }
  0x3f   : > { %959 = vmatprep.mubr.msk.bf16.mxu0 %vm437_vm0, %v1097_v27  ;;  %967 = vmatprep.mubr.msk.bf16.mxu1 %vm437_vm0, %v1099_v28 }
  0x46   : > { %550 = vmatmul.mubr.bf16.gmra.mrb[12].mxu0 %v1101_v29  ;;  %614 = vmatmul.mubr.bf16.gmra.mrb[12].mxu1 %v1102_v30 }
  0x47   : > { %960 = vmatprep.mubr.msk.bf16.mxu0 %vm437_vm0, %v1103_v31  ;;  %968 = vmatprep.mubr.msk.bf16.mxu1 %vm437_vm0, %v1105_v32 }
  0x4e   : > { %558 = vmatmul.mubr.bf16.gmra.mrb[16].mxu0 %v1107_v33  ;;  %622 = vmatmul.mubr.bf16.gmra.mrb[16].mxu1 %v1108_v34 }
  0x4f   : > { %961 = vmatprep.mubr.msk.bf16.mxu0 %vm437_vm0, %v1109_v35  ;;  %969 = vmatprep.mubr.msk.bf16.mxu1 %vm437_vm0, %v1111_v36 }
  0x56   : > { %566 = vmatmul.mubr.bf16.gmra.mrb[20].mxu0 %v1113_v37  ;;  %630 = vmatmul.mubr.bf16.gmra.mrb[20].mxu1 %v1114_v38 }
  0x57   : > { %962 = vmatprep.mubr.msk.bf16.mxu0 %vm437_vm0, %v1115_v39  ;;  %970 = vmatprep.mubr.msk.bf16.mxu1 %vm437_vm0, %v1117_v40 }
  0x5e   : > { %574 = vmatmul.mubr.bf16.gmra.mrb[24].mxu0 %v1119_v41  ;;  %638 = vmatmul.mubr.bf16.gmra.mrb[24].mxu1 %v1120_v42 }
  0x5f   : > { %963 = vmatprep.mubr.msk.bf16.mxu0 %vm437_vm0, %v1121_v43  ;;  %971 = vmatprep.mubr.msk.bf16.mxu1 %vm437_vm0, %v1123_v44 }
  0x66   : > { %582 = vmatmul.mubr.bf16.gmra.mrb[28].mxu0 %v1125_v45  ;;  %646 = vmatmul.mubr.bf16.gmra.mrb[28].mxu1 %v1126_v46 }
 0x101   : > { %v527_v48 = vpop.f32.mrb[0].mxu0  ;;  %v591_v49 = vpop.f32.mrb[0].mxu1 }
 0x102   : > { %v528_v50 = vadd.f32 %v1254_v47, %v527_v48  ;;  %v592_v51 = vadd.f32 %v1254_v47, %v591_v49  ;;  %v529_v52 = vpop.f32.mrb[1].mxu0  ;;  %v593_v53 = vpop.f32.mrb[1].mxu1 }
 0x103   : > { %v530_v54 = vpop.f32.mrb[2].mxu0  ;;  %v594_v55 = vpop.f32.mrb[2].mxu1 }
 0x104   : > { %v654_v56 = vmax.f32 %v528_v50, 0.0  ;;  %v670_v57 = vmax.f32 %v592_v51, 0.0  ;;  %v531_v58 = vadd.f32 %v1254_v47, %v530_v54  ;;  %v595_v59 = vadd.f32 %v1254_v47, %v594_v55  ;;  %v532_v60 = vpop.f32.mrb[3].mxu0  ;;  %v596_v61 = vpop.f32.mrb[3].mxu1 }
 0x106   : > { %v1007_v62 = vpack.c.bf16 %v654_v56, %v654_v56  ;;  %v1023_v63 = vpack.c.bf16 %v670_v57, %v670_v57  ;;  %v655_v0 = vmax.f32 %v531_v58, 0.0  ;;  %v671_v1 = vmax.f32 %v595_v59, 0.0 }
 0x108   : > { %815 = vst.msk [vmem:[%s1264_s18] sm:$0xf] %vm814_vm3, %v1007_v62  ;;  %831 = vst.msk [vmem:[%s1264_s18 + $0x40] sm:$0xf] %vm814_vm3, %v1023_v63  ;;  %v1008_v2 = vpack.c.bf16 %v655_v0, %v655_v0  ;;  %v1024_v3 = vpack.c.bf16 %v671_v1, %v671_v1 }
 0x109   : > { %v535_v4 = vpop.f32.mrb[4].mxu0  ;;  %v599_v5 = vpop.f32.mrb[4].mxu1 }
 0x10a   : > { %816 = vst.msk [vmem:[%s1264_s18 + $0x4] sm:$0xf] %vm814_vm3, %v1008_v2  ;;  %832 = vst.msk [vmem:[%s1264_s18 + $0x44] sm:$0xf] %vm814_vm3, %v1024_v3  ;;  %v536_v6 = vadd.f32 %v1254_v47, %v535_v4  ;;  %v600_v7 = vadd.f32 %v1254_v47, %v599_v5  ;;  %v537_v8 = vpop.f32.mrb[5].mxu0  ;;  %v601_v9 = vpop.f32.mrb[5].mxu1 }
 0x10b   : > { %v538_v10 = vpop.f32.mrb[6].mxu0  ;;  %v602_v11 = vpop.f32.mrb[6].mxu1 }
 0x10c   : > { %v656_v12 = vmax.f32 %v536_v6, 0.0  ;;  %v672_v13 = vmax.f32 %v600_v7, 0.0  ;;  %v539_v14 = vadd.f32 %v1254_v47, %v538_v10  ;;  %v603_v15 = vadd.f32 %v1254_v47, %v602_v11  ;;  %v540_v16 = vpop.f32.mrb[7].mxu0  ;;  %v604_v17 = vpop.f32.mrb[7].mxu1 }
 0x10e   : > { %v1009_v18 = vpack.c.bf16 %v656_v12, %v656_v12  ;;  %v1025_v19 = vpack.c.bf16 %v672_v13, %v672_v13  ;;  %v657_v20 = vmax.f32 %v539_v14, 0.0  ;;  %v673_v21 = vmax.f32 %v603_v15, 0.0 }
 0x110   : > { %817 = vst.msk [vmem:[%s1264_s18 + $0x8] sm:$0xf] %vm814_vm3, %v1009_v18  ;;  %833 = vst.msk [vmem:[%s1264_s18 + $0x48] sm:$0xf] %vm814_vm3, %v1025_v19  ;;  %v1010_v22 = vpack.c.bf16 %v657_v20, %v657_v20  ;;  %v1026_v23 = vpack.c.bf16 %v673_v21, %v673_v21 }
 0x111   : > { %v543_v24 = vpop.f32.mrb[8].mxu0  ;;  %v607_v25 = vpop.f32.mrb[8].mxu1 }
 0x112   : > { %818 = vst.msk [vmem:[%s1264_s18 + $0xc] sm:$0xf] %vm814_vm3, %v1010_v22  ;;  %834 = vst.msk [vmem:[%s1264_s18 + $0x4c] sm:$0xf] %vm814_vm3, %v1026_v23  ;;  %v544_v26 = vadd.f32 %v1254_v47, %v543_v24  ;;  %v608_v27 = vadd.f32 %v1254_v47, %v607_v25  ;;  %v545_v28 = vpop.f32.mrb[9].mxu0  ;;  %v609_v29 = vpop.f32.mrb[9].mxu1 }
 0x113   : > { %v546_v30 = vpop.f32.mrb[10].mxu0  ;;  %v610_v31 = vpop.f32.mrb[10].mxu1 }
 0x114   : > { %v658_v32 = vmax.f32 %v544_v26, 0.0  ;;  %v674_v33 = vmax.f32 %v608_v27, 0.0  ;;  %v547_v34 = vadd.f32 %v1254_v47, %v546_v30  ;;  %v611_v35 = vadd.f32 %v1254_v47, %v610_v31  ;;  %v548_v36 = vpop.f32.mrb[11].mxu0  ;;  %v612_v37 = vpop.f32.mrb[11].mxu1 }
 0x116   : > { %v1011_v38 = vpack.c.bf16 %v658_v32, %v658_v32  ;;  %v1027_v39 = vpack.c.bf16 %v674_v33, %v674_v33  ;;  %v659_v40 = vmax.f32 %v547_v34, 0.0  ;;  %v675_v41 = vmax.f32 %v611_v35, 0.0 }
 0x118   : > { %819 = vst.msk [vmem:[%s1264_s18 + $0x10] sm:$0xf] %vm814_vm3, %v1011_v38  ;;  %835 = vst.msk [vmem:[%s1264_s18 + $0x50] sm:$0xf] %vm814_vm3, %v1027_v39  ;;  %v1012_v42 = vpack.c.bf16 %v659_v40, %v659_v40  ;;  %v1028_v43 = vpack.c.bf16 %v675_v41, %v675_v41 }
 0x119   : > { %v551_v44 = vpop.f32.mrb[12].mxu0  ;;  %v615_v45 = vpop.f32.mrb[12].mxu1 }
 0x11a   : > { %820 = vst.msk [vmem:[%s1264_s18 + $0x14] sm:$0xf] %vm814_vm3, %v1012_v42  ;;  %836 = vst.msk [vmem:[%s1264_s18 + $0x54] sm:$0xf] %vm814_vm3, %v1028_v43  ;;  %v552_v46 = vadd.f32 %v1254_v47, %v551_v44  ;;  %v616_v48 = vadd.f32 %v1254_v47, %v615_v45  ;;  %v553_v49 = vpop.f32.mrb[13].mxu0  ;;  %v617_v50 = vpop.f32.mrb[13].mxu1 }
 0x11b   : > { %v554_v51 = vpop.f32.mrb[14].mxu0  ;;  %v618_v52 = vpop.f32.mrb[14].mxu1 }
 0x11c   : > { %v660_v53 = vmax.f32 %v552_v46, 0.0  ;;  %v676_v54 = vmax.f32 %v616_v48, 0.0  ;;  %v555_v55 = vadd.f32 %v1254_v47, %v554_v51  ;;  %v619_v56 = vadd.f32 %v1254_v47, %v618_v52  ;;  %v556_v57 = vpop.f32.mrb[15].mxu0  ;;  %v620_v58 = vpop.f32.mrb[15].mxu1 }
 0x11e   : > { %v1013_v59 = vpack.c.bf16 %v660_v53, %v660_v53  ;;  %v1029_v60 = vpack.c.bf16 %v676_v54, %v676_v54  ;;  %v661_v61 = vmax.f32 %v555_v55, 0.0  ;;  %v677_v62 = vmax.f32 %v619_v56, 0.0 }
 0x120   : > { %821 = vst.msk [vmem:[%s1264_s18 + $0x18] sm:$0xf] %vm814_vm3, %v1013_v59  ;;  %837 = vst.msk [vmem:[%s1264_s18 + $0x58] sm:$0xf] %vm814_vm3, %v1029_v60  ;;  %v1014_v63 = vpack.c.bf16 %v661_v61, %v661_v61  ;;  %v1030_v0 = vpack.c.bf16 %v677_v62, %v677_v62 }
 0x121   : > { %v559_v1 = vpop.f32.mrb[16].mxu0  ;;  %v623_v2 = vpop.f32.mrb[16].mxu1 }
 0x122   : > { %822 = vst.msk [vmem:[%s1264_s18 + $0x1c] sm:$0xf] %vm814_vm3, %v1014_v63  ;;  %838 = vst.msk [vmem:[%s1264_s18 + $0x5c] sm:$0xf] %vm814_vm3, %v1030_v0  ;;  %v560_v3 = vadd.f32 %v1254_v47, %v559_v1  ;;  %v624_v4 = vadd.f32 %v1254_v47, %v623_v2  ;;  %v561_v5 = vpop.f32.mrb[17].mxu0  ;;  %v625_v6 = vpop.f32.mrb[17].mxu1 }
 0x123   : > { %v562_v7 = vpop.f32.mrb[18].mxu0  ;;  %v626_v8 = vpop.f32.mrb[18].mxu1 }
 0x124   : > { %v662_v9 = vmax.f32 %v560_v3, 0.0  ;;  %v678_v10 = vmax.f32 %v624_v4, 0.0  ;;  %v563_v11 = vadd.f32 %v1254_v47, %v562_v7  ;;  %v627_v12 = vadd.f32 %v1254_v47, %v626_v8  ;;  %v564_v13 = vpop.f32.mrb[19].mxu0  ;;  %v628_v14 = vpop.f32.mrb[19].mxu1 }
 0x126   : > { %v1015_v15 = vpack.c.bf16 %v662_v9, %v662_v9  ;;  %v1031_v16 = vpack.c.bf16 %v678_v10, %v678_v10  ;;  %v663_v17 = vmax.f32 %v563_v11, 0.0  ;;  %v679_v18 = vmax.f32 %v627_v12, 0.0 }
 0x128   : > { %823 = vst.msk [vmem:[%s1264_s18 + $0x20] sm:$0xf] %vm814_vm3, %v1015_v15  ;;  %839 = vst.msk [vmem:[%s1264_s18 + $0x60] sm:$0xf] %vm814_vm3, %v1031_v16  ;;  %v1016_v19 = vpack.c.bf16 %v663_v17, %v663_v17  ;;  %v1032_v20 = vpack.c.bf16 %v679_v18, %v679_v18 }
 0x129   : > { %v567_v21 = vpop.f32.mrb[20].mxu0  ;;  %v631_v22 = vpop.f32.mrb[20].mxu1 }
 0x12a   : > { %824 = vst.msk [vmem:[%s1264_s18 + $0x24] sm:$0xf] %vm814_vm3, %v1016_v19  ;;  %840 = vst.msk [vmem:[%s1264_s18 + $0x64] sm:$0xf] %vm814_vm3, %v1032_v20  ;;  %v568_v23 = vadd.f32 %v1254_v47, %v567_v21  ;;  %v632_v24 = vadd.f32 %v1254_v47, %v631_v22  ;;  %v569_v25 = vpop.f32.mrb[21].mxu0  ;;  %v633_v26 = vpop.f32.mrb[21].mxu1 }
 0x12b   : > { %v570_v27 = vpop.f32.mrb[22].mxu0  ;;  %v634_v28 = vpop.f32.mrb[22].mxu1 }
 0x12c   : > { %v664_v29 = vmax.f32 %v568_v23, 0.0  ;;  %v680_v30 = vmax.f32 %v632_v24, 0.0  ;;  %v571_v31 = vadd.f32 %v1254_v47, %v570_v27  ;;  %v635_v32 = vadd.f32 %v1254_v47, %v634_v28  ;;  %v572_v33 = vpop.f32.mrb[23].mxu0  ;;  %v636_v34 = vpop.f32.mrb[23].mxu1 }
 0x12e   : > { %v1017_v35 = vpack.c.bf16 %v664_v29, %v664_v29  ;;  %v1033_v36 = vpack.c.bf16 %v680_v30, %v680_v30  ;;  %v665_v37 = vmax.f32 %v571_v31, 0.0  ;;  %v681_v38 = vmax.f32 %v635_v32, 0.0 }
 0x130   : > { %825 = vst.msk [vmem:[%s1264_s18 + $0x28] sm:$0xf] %vm814_vm3, %v1017_v35  ;;  %841 = vst.msk [vmem:[%s1264_s18 + $0x68] sm:$0xf] %vm814_vm3, %v1033_v36  ;;  %v1018_v39 = vpack.c.bf16 %v665_v37, %v665_v37  ;;  %v1034_v40 = vpack.c.bf16 %v681_v38, %v681_v38 }
 0x131   : > { %v575_v41 = vpop.f32.mrb[24].mxu0  ;;  %v639_v42 = vpop.f32.mrb[24].mxu1 }
 0x132   : > { %826 = vst.msk [vmem:[%s1264_s18 + $0x2c] sm:$0xf] %vm814_vm3, %v1018_v39  ;;  %842 = vst.msk [vmem:[%s1264_s18 + $0x6c] sm:$0xf] %vm814_vm3, %v1034_v40  ;;  %v576_v43 = vadd.f32 %v1254_v47, %v575_v41  ;;  %v640_v44 = vadd.f32 %v1254_v47, %v639_v42  ;;  %v577_v45 = vpop.f32.mrb[25].mxu0  ;;  %v641_v46 = vpop.f32.mrb[25].mxu1 }
 0x133   : > { %v578_v48 = vpop.f32.mrb[26].mxu0  ;;  %v642_v49 = vpop.f32.mrb[26].mxu1 }
 0x134   : > { %v666_v50 = vmax.f32 %v576_v43, 0.0  ;;  %v682_v51 = vmax.f32 %v640_v44, 0.0  ;;  %v579_v52 = vadd.f32 %v1254_v47, %v578_v48  ;;  %v643_v53 = vadd.f32 %v1254_v47, %v642_v49  ;;  %v580_v54 = vpop.f32.mrb[27].mxu0  ;;  %v644_v55 = vpop.f32.mrb[27].mxu1 }
 0x136   : > { %v1019_v56 = vpack.c.bf16 %v666_v50, %v666_v50  ;;  %v1035_v57 = vpack.c.bf16 %v682_v51, %v682_v51  ;;  %v667_v58 = vmax.f32 %v579_v52, 0.0  ;;  %v683_v59 = vmax.f32 %v643_v53, 0.0 }
 0x138   : > { %827 = vst.msk [vmem:[%s1264_s18 + $0x30] sm:$0xf] %vm814_vm3, %v1019_v56  ;;  %843 = vst.msk [vmem:[%s1264_s18 + $0x70] sm:$0xf] %vm814_vm3, %v1035_v57  ;;  %v1020_v60 = vpack.c.bf16 %v667_v58, %v667_v58  ;;  %v1036_v61 = vpack.c.bf16 %v683_v59, %v683_v59 }
 0x139   : > { %v583_v62 = vpop.f32.mrb[28].mxu0  ;;  %v647_v63 = vpop.f32.mrb[28].mxu1 }
 0x13a   : > { %828 = vst.msk [vmem:[%s1264_s18 + $0x34] sm:$0xf] %vm814_vm3, %v1020_v60  ;;  %844 = vst.msk [vmem:[%s1264_s18 + $0x74] sm:$0xf] %vm814_vm3, %v1036_v61  ;;  %v584_v0 = vadd.f32 %v1254_v47, %v583_v62  ;;  %v648_v1 = vadd.f32 %v1254_v47, %v647_v63  ;;  %v585_v2 = vpop.f32.mrb[29].mxu0  ;;  %v649_v3 = vpop.f32.mrb[29].mxu1 }
 0x13b   : > { %v586_v4 = vpop.f32.mrb[30].mxu0  ;;  %v650_v5 = vpop.f32.mrb[30].mxu1 }
 0x13c   : > { %v668_v6 = vmax.f32 %v584_v0, 0.0  ;;  %v684_v7 = vmax.f32 %v648_v1, 0.0  ;;  %v587_v8 = vadd.f32 %v1254_v47, %v586_v4  ;;  %v651_v9 = vadd.f32 %v1254_v47, %v650_v5  ;;  %v588_v10 = vpop.f32.mrb[31].mxu0  ;;  %v652_v11 = vpop.f32.mrb[31].mxu1 }
 0x13e   : > { %v1021_v12 = vpack.c.bf16 %v668_v6, %v668_v6  ;;  %v1037_v13 = vpack.c.bf16 %v684_v7, %v684_v7  ;;  %v669_v14 = vmax.f32 %v587_v8, 0.0  ;;  %v685_v15 = vmax.f32 %v651_v9, 0.0 }
 0x140   : > { %829 = vst.msk [vmem:[%s1264_s18 + $0x38] sm:$0xf] %vm814_vm3, %v1021_v12  ;;  %845 = vst.msk [vmem:[%s1264_s18 + $0x78] sm:$0xf] %vm814_vm3, %v1037_v13  ;;  %v1022_v16 = vpack.c.bf16 %v669_v14, %v669_v14  ;;  %v1038_v17 = vpack.c.bf16 %v685_v15, %v685_v15 }
 0x142   : > { %830 = vst.msk [vmem:[%s1264_s18 + $0x3c] sm:$0xf] %vm814_vm3, %v1022_v16  ;;  %846 = vst.msk [vmem:[%s1264_s18 + $0x7c] sm:$0xf] %vm814_vm3, %v1038_v17 }
 0x143 PF: > { %s13_s12 = sadd.s32 1, %s1133_s12  }
 0x144   : > { %p10_p4 = scmp.ge.s32.totalorder %s13_s12, 4  }
 0x146   :  { %12 = sbr.rel (!%p10_p4) target bundleno = 1 (0x1), region = 62 }

</bundles_post_ra>
